<compile_context>
chip_gen: v6e
topology: v6e:2x2x1
jax: 0.10.0
libtpu: 0.0.40
codegen_flags: <defaults>
</compile_context>

<pallas_src>
import jax
import jax.numpy as jnp
from jax.experimental import pallas as pl
from jax.experimental.pallas import tpu as pltpu

NUM_EMBEDDINGS = 100   # nn.Embedding(100, feat_dim, padding_idx=0)
K_PAD = 128            # one-hot / table rows padded to the MXU/lane width


def prepare_embedding_table(embed_table):
    """Do once at init (outside the jitted step): split the f32 table into
    three bf16 slabs whose sum reconstructs the f32 values exactly, and pad
    rows 100 -> 128 with zeros.  Returns (hi, mid, lo), each (128, F) bf16."""
    t = embed_table.astype(jnp.float32)
    rows, feat_dim = t.shape
    assert rows <= K_PAD

    hi = t.astype(jnp.bfloat16)
    r1 = t - hi.astype(jnp.float32)           # exact in f32
    mid = r1.astype(jnp.bfloat16)
    r2 = r1 - mid.astype(jnp.float32)         # exact in f32
    lo = r2.astype(jnp.bfloat16)

    def pad_rows(x):
        out = jnp.zeros((K_PAD, feat_dim), dtype=jnp.bfloat16)
        return out.at[:rows, :].set(x)

    return pad_rows(hi), pad_rows(mid), pad_rows(lo)


def _gather(z_ref, hi_ref, mid_ref, lo_ref):
    # z_ref: (TA, 1) int32; *_ref: (128, F) bf16 (VMEM-resident, constant block)
    z = z_ref[...]
    ta = z.shape[0]
    ids = jax.lax.broadcasted_iota(jnp.int32, (ta, K_PAD), 1)
    onehot = (ids == z).astype(jnp.bfloat16)              # (TA, 128) bf16, exact
    # 3 single-pass bf16 dots accumulated in f32: the one-hot is exact in bf16
    # and hi+mid+lo reconstructs the f32 table, so the gather is (bit-)exact.
    s = jnp.dot(onehot, hi_ref[...], preferred_element_type=jnp.float32)
    s = s + jnp.dot(onehot, mid_ref[...], preferred_element_type=jnp.float32)
    s = s + jnp.dot(onehot, lo_ref[...], preferred_element_type=jnp.float32)
    return s


def _embed_s_kernel(z_ref, hi_ref, mid_ref, lo_ref, s_ref):
    s_ref[...] = _gather(z_ref, hi_ref, mid_ref, lo_ref).astype(s_ref.dtype)


def _embed_sv_kernel(z_ref, hi_ref, mid_ref, lo_ref, s_ref, v_ref):
    s_ref[...] = _gather(z_ref, hi_ref, mid_ref, lo_ref).astype(s_ref.dtype)
    v_ref[...] = jnp.zeros_like(v_ref)    # fused zero vector features (lane-dense)


def embedding_block(z_number, table_slabs, *, tile_atoms=None):
    """Pallas implementation of EmbeddingBlock.forward.

    Args:
      z_number:    (num_atoms,) int atomic numbers in [0, 100).
      table_slabs: output of prepare_embedding_table(embed_table) — compute it
                   once at parameter init, not per forward.
    Returns:
      (s_i, v_i): ((num_atoms, feat_dim) f32, (num_atoms, feat_dim, 3) f32)

    Note: out-of-range z yields an all-zero row (one-hot gather semantics)
    instead of erroring like nn.Embedding.
    """
    hi, mid, lo = table_slabs
    feat_dim = hi.shape[1]
    num_atoms = z_number.shape[0]

    # Pad rows only to the sublane granularity (8); pick a big tile that covers it.
    padded8 = max(8, pl.cdiv(num_atoms, 8) * 8)
    if tile_atoms is None:
        tile_atoms = min(1024, padded8)
    tile_atoms = max(8, (tile_atoms // 8) * 8)
    grid_len = pl.cdiv(padded8, tile_atoms)
    padded = grid_len * tile_atoms

    z2d = (
        jnp.zeros((padded, 1), dtype=jnp.int32)
        .at[:num_atoms, 0]
        .set(z_number.astype(jnp.int32))
    )

    # Fuse the v_i zero-fill into the kernel only when no row de-pad slice is
    # needed afterwards; otherwise a direct XLA fill of exactly num_atoms rows
    # is cheaper than writing padded rows + a 3x-sized slice copy.
    fuse_v = padded == num_atoms

    table_spec = pl.BlockSpec((K_PAD, feat_dim), lambda i: (0, 0))
    in_specs = [
        pl.BlockSpec((tile_atoms, 1), lambda i: (i, 0)),
        table_spec,
        table_spec,
        table_spec,
    ]
    s_spec = pl.BlockSpec((tile_atoms, feat_dim), lambda i: (i, 0))

    if fuse_v:
        out_shape = (
            jax.ShapeDtypeStruct((padded, feat_dim), jnp.float32),
            jax.ShapeDtypeStruct((padded, feat_dim * 3), jnp.float32),
        )
        out_specs = (
            s_spec,
            pl.BlockSpec((tile_atoms, feat_dim * 3), lambda i: (i, 0)),
        )
        kernel = _embed_sv_kernel
    else:
        out_shape = jax.ShapeDtypeStruct((padded, feat_dim), jnp.float32)
        out_specs = s_spec
        kernel = _embed_s_kernel

    result = pl.pallas_call(
        kernel,
        out_shape=out_shape,
        grid_spec=pltpu.PrefetchScalarGridSpec(
            num_scalar_prefetch=0,
            grid=(grid_len,),
            in_specs=in_specs,
            out_specs=out_specs,
        ),
        compiler_params=pltpu.CompilerParams(
            dimension_semantics=("parallel",),
        ),
    )(z2d, hi, mid, lo)

    if fuse_v:
        s_i, v_flat = result
        v_i = v_flat.reshape(num_atoms, feat_dim, 3)   # contiguous, metadata-only
    else:
        s_i = result[:num_atoms]
        # TODO(synk): ideally the downstream interaction block initialises its
        # vector features internally so v_i never hits HBM at all.
        v_i = jnp.zeros((num_atoms, feat_dim, 3), dtype=jnp.float32)
    return s_i, v_i


def make_embedding_table(key, feat_dim):
    """Deterministic init matching nn.Embedding(100, feat_dim, padding_idx=0):
    N(0, 1) weights with row 0 (padding) zeroed."""
    w = jax.random.normal(key, (NUM_EMBEDDINGS, feat_dim), dtype=jnp.float32)
    return w.at[0].set(0.0)


if __name__ == "__main__":
    key = jax.random.PRNGKey(0)
    k_table, k_z = jax.random.split(key)

    feat_dim = 64
    num_atoms = 16

    embed_table = make_embedding_table(k_table, feat_dim)
    table_slabs = prepare_embedding_table(embed_table)   # once, at "init"

    # Atomic numbers in [0, 100); include a 0 to exercise the padding row.
    z_number = jax.random.randint(
        k_z, (num_atoms,), 0, NUM_EMBEDDINGS, dtype=jnp.int32
    )
    z_number = z_number.at[3].set(0)

    s_i, v_i = embedding_block(z_number, table_slabs)
    jax.block_until_ready((s_i, v_i))

    s_ref = embed_table[z_number]
    assert s_i.shape == (num_atoms, feat_dim)
    assert v_i.shape == (num_atoms, feat_dim, 3)
    assert jnp.allclose(s_i, s_ref, atol=1e-6)
    assert jnp.allclose(s_i[3], 0.0)          # padding_idx row
    assert jnp.all(v_i == 0.0)

    # Non-multiple-of-8 atom count exercises the row-padded (non-fused v) path.
    num_atoms2 = 13
    z2 = jax.random.randint(
        jax.random.PRNGKey(7), (num_atoms2,), 0, NUM_EMBEDDINGS, dtype=jnp.int32
    )
    s2, v2 = embedding_block(z2, table_slabs)
    jax.block_until_ready((s2, v2))
    assert s2.shape == (num_atoms2, feat_dim)
    assert v2.shape == (num_atoms2, feat_dim, 3)
    assert jnp.allclose(s2, embed_table[z2], atol=1e-6)
    assert jnp.all(v2 == 0.0)

    print("KERNEL_OK")
</pallas_src>

<mosaic_0001>
module attributes {stable_mosaic.version = 11 : i64} {
  func.func @_embed_sv_kernel(%arg0: i32, %arg1: memref<16x1xi32, #tpu.memory_space<vmem>>, %arg2: memref<128x64xbf16, #tpu.memory_space<vmem>>, %arg3: memref<128x64xbf16, #tpu.memory_space<vmem>>, %arg4: memref<128x64xbf16, #tpu.memory_space<vmem>>, %arg5: memref<16x64xf32, #tpu.memory_space<vmem>>, %arg6: memref<16x192xf32, #tpu.memory_space<vmem>>) attributes {dimension_semantics = [#tpu.dimension_semantics<parallel>], iteration_bounds = array<i64: 1>, scalar_prefetch = 0 : i64, scratch_operands = 0 : i64, tpu.core_type = #tpu.core_type<tc>, window_params = [{transform_indices = @transform_0, window_bounds = array<i64: 16, 1>}, {pipeline_mode = #tpu.pipeline_mode<synchronous>, transform_indices = @transform_1, window_bounds = array<i64: 128, 64>}, {pipeline_mode = #tpu.pipeline_mode<synchronous>, transform_indices = @transform_2, window_bounds = array<i64: 128, 64>}, {pipeline_mode = #tpu.pipeline_mode<synchronous>, transform_indices = @transform_3, window_bounds = array<i64: 128, 64>}, {transform_indices = @transform_4, window_bounds = array<i64: 16, 64>}, {transform_indices = @transform_5, window_bounds = array<i64: 16, 192>}]} {
    %c0 = arith.constant 0 : index
    %c0_0 = arith.constant 0 : index
    %0 = vector.load %arg1[%c0, %c0_0] : memref<16x1xi32, #tpu.memory_space<vmem>>, vector<16x1xi32>
    %1 = tpu.iota {dimensions = array<i32: 1>} : vector<16x128xi32>
    %2 = vector.broadcast %0 : vector<16x1xi32> to vector<16x128xi32>
    %3 = arith.cmpi eq, %1, %2 : vector<16x128xi32>
    %4 = arith.extui %3 : vector<16x128xi1> to vector<16x128xi32>
    %5 = arith.sitofp %4 : vector<16x128xi32> to vector<16x128xf32>
    %6 = arith.truncf %5 : vector<16x128xf32> to vector<16x128xbf16>
    %c0_1 = arith.constant 0 : index
    %c0_2 = arith.constant 0 : index
    %7 = vector.load %arg2[%c0_1, %c0_2] : memref<128x64xbf16, #tpu.memory_space<vmem>>, vector<128x64xbf16>
    %cst = arith.constant dense<0.000000e+00> : vector<16x64xf32>
    %8 = tpu.matmul %6, %7, %cst {dimension_numbers = #tpu.dot_dimension_numbers<[1], [0], [0], [1], [0, 0, 1, 1], [], []>} : vector<16x128xbf16>, vector<128x64xbf16>, vector<16x64xf32> -> vector<16x64xf32>
    %c0_3 = arith.constant 0 : index
    %c0_4 = arith.constant 0 : index
    %9 = vector.load %arg3[%c0_3, %c0_4] : memref<128x64xbf16, #tpu.memory_space<vmem>>, vector<128x64xbf16>
    %cst_5 = arith.constant dense<0.000000e+00> : vector<16x64xf32>
    %10 = tpu.matmul %6, %9, %cst_5 {dimension_numbers = #tpu.dot_dimension_numbers<[1], [0], [0], [1], [0, 0, 1, 1], [], []>} : vector<16x128xbf16>, vector<128x64xbf16>, vector<16x64xf32> -> vector<16x64xf32>
    %11 = arith.addf %8, %10 : vector<16x64xf32>
    %c0_6 = arith.constant 0 : index
    %c0_7 = arith.constant 0 : index
    %12 = vector.load %arg4[%c0_6, %c0_7] : memref<128x64xbf16, #tpu.memory_space<vmem>>, vector<128x64xbf16>
    %cst_8 = arith.constant dense<0.000000e+00> : vector<16x64xf32>
    %13 = tpu.matmul %6, %12, %cst_8 {dimension_numbers = #tpu.dot_dimension_numbers<[1], [0], [0], [1], [0, 0, 1, 1], [], []>} : vector<16x128xbf16>, vector<128x64xbf16>, vector<16x64xf32> -> vector<16x64xf32>
    %14 = arith.addf %11, %13 : vector<16x64xf32>
    %c0_9 = arith.constant 0 : index
    %c0_10 = arith.constant 0 : index
    %15 = vector.load %arg5[%c0_9, %c0_10] : memref<16x64xf32, #tpu.memory_space<vmem>>, vector<16x64xf32>
    tpu.vector_store %arg5[%c0_9, %c0_10], %14 {strides = array<i32>} : memref<16x64xf32, #tpu.memory_space<vmem>>, vector<16x64xf32>,
    %cst_11 = arith.constant 0.000000e+00 : f32
    %16 = vector.broadcast %cst_11 : f32 to vector<16x192xf32>
    %c0_12 = arith.constant 0 : index
    %c0_13 = arith.constant 0 : index
    %17 = vector.load %arg6[%c0_12, %c0_13] : memref<16x192xf32, #tpu.memory_space<vmem>>, vector<16x192xf32>
    tpu.vector_store %arg6[%c0_12, %c0_13], %16 {strides = array<i32>} : memref<16x192xf32, #tpu.memory_space<vmem>>, vector<16x192xf32>,
    return
  }
  func.func @transform_0(%arg0: i32) -> (i32, i32) {
    %c0_i32 = arith.constant 0 : i32
    %c0_i32_0 = arith.constant 0 : i32
    return %arg0, %c0_i32 : i32, i32
  }
  func.func @transform_1(%arg0: i32) -> (i32, i32) {
    %c0_i32 = arith.constant 0 : i32
    %c0_i32_0 = arith.constant 0 : i32
    %c0_i32_1 = arith.constant 0 : i32
    return %c0_i32, %c0_i32_0 : i32, i32
  }
  func.func @transform_2(%arg0: i32) -> (i32, i32) {
    %c0_i32 = arith.constant 0 : i32
    %c0_i32_0 = arith.constant 0 : i32
    %c0_i32_1 = arith.constant 0 : i32
    return %c0_i32, %c0_i32_0 : i32, i32
  }
  func.func @transform_3(%arg0: i32) -> (i32, i32) {
    %c0_i32 = arith.constant 0 : i32
    %c0_i32_0 = arith.constant 0 : i32
    %c0_i32_1 = arith.constant 0 : i32
    return %c0_i32, %c0_i32_0 : i32, i32
  }
  func.func @transform_4(%arg0: i32) -> (i32, i32) {
    %c0_i32 = arith.constant 0 : i32
    %c0_i32_0 = arith.constant 0 : i32
    return %arg0, %c0_i32 : i32, i32
  }
  func.func @transform_5(%arg0: i32) -> (i32, i32) {
    %c0_i32 = arith.constant 0 : i32
    %c0_i32_0 = arith.constant 0 : i32
    return %arg0, %c0_i32 : i32, i32
  }
}

</mosaic_0001>

<bundles_post_ra>
// kernel: tpu_custom_call.1
= control target key start
LH: loop header
LB: loop body
LE: loop exit
PB: predicated region body
PF: predicated region fallthrough
CT: control target
= control target key end

     0   :  { %11 = vsyncpa [#allocation3], 0  ;;  %v593_v1 = vmov 0   ;;  %v594_v3 = vmov 0.0   ;;  %vm595_vm0 = vmmov 0   ;;  %s765_s0 = inlined_call_operand.vmem [shape: s32[16,1], index: 0, kind: input, shape index: {}]   ;;  %s766_s1 = inlined_call_operand.vmem [shape: bf16[128,64], index: 1, kind: input, shape index: {}]   ;;  %s767_s2 = inlined_call_operand.vmem [shape: bf16[128,64], index: 2, kind: input, shape index: {}]   ;;  %s768_s3 = inlined_call_operand.vmem [shape: bf16[128,64], index: 3, kind: input, shape index: {}]   ;;  %s769_s4 = inlined_call_operand.hbm [shape: f32[16,64], index: 4, kind: output, shape index: {0}]   ;;  %s770_s5 = inlined_call_operand.hbm [shape: f32[16,192], index: 5, kind: output, shape index: {1}]  }
   0x1   :  { %v22_v0 = vld [vmem:[%s765_s0] sm:$0xff]  ;;  %524 = vset.pattern.permute.xlu0 %v593_v1  ;;  %v23_v2 = vld [vmem:[%s765_s0 + $0x8] sm:$0xff]  ;;  %454 = vmatprep.subr.bf16.mxu0 %v594_v3  ;;  %359 = vst [vmem:[#allocation4] sm:$0xff] %v594_v3  ;;  %361 = vst [vmem:[#allocation4 + $0x10] sm:$0xff] %v594_v3 }
   0x2   :  { %v525_v4 = vld [vmem:[%s767_s2 + $0x38] sm:$0xff]   ;;  %27 = vperm.xlu0 %524, %v22_v0   ;;  %474 = vmatprep.subr.bf16.mxu1 %v594_v3  ;;  %v527_v6 = vld [vmem:[%s767_s2 + $0x30] sm:$0xff]   ;;  %v529_v8 = vld [vmem:[%s767_s2 + $0x28] sm:$0xff]  }
   0x3   :  { %v526_v5 = vld [vmem:[%s766_s1 + $0x38] sm:$0xff]   ;;  %455 = vmatpush3.bf16.msra.mxu0 %v525_v4  ;;  %v528_v7 = vld [vmem:[%s766_s1 + $0x30] sm:$0xff]   ;;  %470 = vmatprep.mubr.msk.bf16.mxu0 %vm595_vm0, %v594_v3  ;;  %v530_v9 = vld [vmem:[%s766_s1 + $0x28] sm:$0xff]  }
   0x4   :  { %475 = vmatpush3.bf16.msra.mxu1 %v526_v5  ;;  %456 = vmatprep.subr.bf16.mxu0 %v594_v3  ;;  %v531_v10 = vld [vmem:[%s767_s2 + $0x20] sm:$0xff]   ;;  %v533_v12 = vld [vmem:[%s767_s2 + $0x18] sm:$0xff]   ;;  %v535_v14 = vld [vmem:[%s767_s2 + $0x10] sm:$0xff]  }
   0x5   :  { %476 = vmatprep.subr.bf16.mxu1 %v594_v3  ;;  %490 = vmatprep.mubr.msk.bf16.mxu1 %vm595_vm0, %v594_v3  ;;  %v532_v11 = vld [vmem:[%s766_s1 + $0x20] sm:$0xff]   ;;  %v534_v13 = vld [vmem:[%s766_s1 + $0x18] sm:$0xff]   ;;  %v536_v15 = vld [vmem:[%s766_s1 + $0x10] sm:$0xff]  }
   0x6   :  { %30 = vperm.xlu0 %524, %v23_v2   ;;  %v537_v16 = vld [vmem:[%s767_s2 + $0x8] sm:$0xff]  }
   0x7   :  { %457 = vmatpush3.bf16.msra.mxu0 %v527_v6  ;;  %v538_v17 = vld [vmem:[%s766_s1 + $0x8] sm:$0xff]  }
   0x8   :  { %477 = vmatpush3.bf16.msra.mxu1 %v528_v7  ;;  %458 = vmatprep.subr.bf16.mxu0 %v594_v3 }
   0x9   :  { %478 = vmatprep.subr.bf16.mxu1 %v594_v3 }
   0xb   :  { %459 = vmatpush3.bf16.msra.mxu0 %v529_v8 }
   0xc   :  { %479 = vmatpush3.bf16.msra.mxu1 %v530_v9  ;;  %460 = vmatprep.subr.bf16.mxu0 %v594_v3 }
   0xd   :  { %480 = vmatprep.subr.bf16.mxu1 %v594_v3 }
   0xf   :  { %461 = vmatpush3.bf16.msra.mxu0 %v531_v10 }
  0x10   :  { %481 = vmatpush3.bf16.msra.mxu1 %v532_v11  ;;  %462 = vmatprep.subr.bf16.mxu0 %v594_v3 }
  0x11   :  { %482 = vmatprep.subr.bf16.mxu1 %v594_v3 }
  0x13   :  { %463 = vmatpush3.bf16.msra.mxu0 %v533_v12 }
  0x14   :  { %483 = vmatpush3.bf16.msra.mxu1 %v534_v13  ;;  %464 = vmatprep.subr.bf16.mxu0 %v594_v3 }
  0x15   :  { %484 = vmatprep.subr.bf16.mxu1 %v594_v3 }
  0x17   :  { %465 = vmatpush3.bf16.msra.mxu0 %v535_v14 }
  0x18   :  { %485 = vmatpush3.bf16.msra.mxu1 %v536_v15  ;;  %466 = vmatprep.subr.bf16.mxu0 %v594_v3 }
  0x19   :  { %12 = vsyncpa [#allocation5], 0  ;;  %486 = vmatprep.subr.bf16.mxu1 %v594_v3  ;;  %v539_v18 = vld [vmem:[%s767_s2] sm:$0xff]   ;;  %v24_v20 = vlaneseq  ;;  %v541_v24 = vld [vmem:[%s768_s3 + $0x38] sm:$0xff]   ;;  %v596_v26 = vmov 1.0|1.0  }
  0x1a   :  { %v540_v19 = vld [vmem:[%s766_s1] sm:$0xff]   ;;  %v542_v27 = vld [vmem:[%s768_s3 + $0x30] sm:$0xff]   ;;  %v543_v28 = vld [vmem:[%s768_s3 + $0x28] sm:$0xff]   ;;  %vm356_vm4 = vcmask 523264   ;;  %s597_s16 = smov [#allocation4]  }
  0x1b   :  { %467 = vmatpush3.bf16.msra.mxu0 %v537_v16  ;;  %v25_v22 = vand.u32 127, %v24_v20  ;;  %v544_v29 = vld [vmem:[%s768_s3 + $0x20] sm:$0xff]   ;;  %v545_v30 = vld [vmem:[%s768_s3 + $0x18] sm:$0xff]   ;;  %v546_v31 = vld [vmem:[%s768_s3 + $0x10] sm:$0xff]   ;;  %360 = vst.msk [vmem:[#allocation4 + $0x8] sm:$0xff] %vm356_vm4, %v594_v3  ;;  %s380_s17 = sshll.u32 %s597_s16, 4  ;;  %s381_s17 = int_to_ptr.vmem [resolvable:$true] %s380_s17 }
  0x1c   :  { %487 = vmatpush3.bf16.msra.mxu1 %v538_v17  ;;  %468 = vmatprep.subr.bf16.mxu0 %v594_v3  ;;  %v547_v32 = vld [vmem:[%s768_s3 + $0x8] sm:$0xff]   ;;  %v548_v33 = vld [vmem:[%s768_s3] sm:$0xff]   ;;  %362 = vst.msk [vmem:[#allocation4 + $0x18] sm:$0xff] %vm356_vm4, %v594_v3  ;;  %s549_s18 = scalar_lea.vmem %s381_s17, 512  ;;  %p554_p1 = scmp.lt.s32.totalorder %s381_s17, %s381_s17 }
  0x1d   :  { %488 = vmatprep.subr.bf16.mxu1 %v594_v3  ;;  %p550_p0 = scmp.ne.s32.totalorder %s381_s17, %s549_s18  ;;  %p555_p2 = scmp.lt.s32.totalorder %s549_s18, %s549_s18 }
  0x1f   :  { %469 = vmatpush3.bf16.msra.mxu0 %v539_v18  ;;  %p556_p3 = por %p555_p2, %p554_p1 }
  0x20   :  { %489 = vmatpush3.bf16.msra.mxu1 %v540_v19  ;;  %494 = vmatprep.subr.bf16.mxu0 %v594_v3 }
  0x21   :  { %p557_p4 = pnand %p556_p3, %p550_p0 }
  0x7d   :  { %v28_v21 = vpop.permute.xlu0 %27 }
  0x7e   :  { %vm32_vm1 = vcmp.eq.s32.totalorder %v25_v22, %v28_v21 }
  0x81   :  { %v31_v23 = vpop.permute.xlu0 %30 }
  0x82   :  { %vm33_vm2 = vcmp.eq.s32.totalorder %v25_v22, %v31_v23 }
  0x83   :  { %vm713_vm3 = vmpackc.low %vm33_vm2, %vm32_vm1 }
  0x84   :  { %471 = vmatmul.mubr.msk.bf16.vlgmr.msra.gmra.mxu0 %vm713_vm3, %v596_v26  ;;  %491 = vmatmul.mubr.msk.bf16.vlgmr.msra.gmra.mxu1 %vm713_vm3, %v596_v26 }
  0x85   :  { %495 = vmatpush3.bf16.msra.mxu0 %v541_v24  ;;  %510 = vmatprep.mubr.msk.bf16.mxu0 %vm595_vm0, %v594_v3 }
  0x86   :  { %496 = vmatprep.subr.bf16.mxu0 %v594_v3 }
  0x89   :  { %497 = vmatpush3.bf16.msra.mxu0 %v542_v27 }
  0x8a   :  { %498 = vmatprep.subr.bf16.mxu0 %v594_v3 }
  0x8d   :  { %499 = vmatpush3.bf16.msra.mxu0 %v543_v28 }
  0x8e   :  { %500 = vmatprep.subr.bf16.mxu0 %v594_v3 }
  0x91   :  { %501 = vmatpush3.bf16.msra.mxu0 %v544_v29 }
  0x92   :  { %502 = vmatprep.subr.bf16.mxu0 %v594_v3 }
  0x95   :  { %503 = vmatpush3.bf16.msra.mxu0 %v545_v30 }
  0x96   :  { %504 = vmatprep.subr.bf16.mxu0 %v594_v3 }
  0x99   :  { %505 = vmatpush3.bf16.msra.mxu0 %v546_v31 }
  0x9a   :  { %506 = vmatprep.subr.bf16.mxu0 %v594_v3 }
  0x9d   :  { %507 = vmatpush3.bf16.msra.mxu0 %v547_v32 }
  0x9e   :  { %508 = vmatprep.subr.bf16.mxu0 %v594_v3 }
  0xa1   :  { %509 = vmatpush3.bf16.msra.mxu0 %v548_v33 }
  0xa4   :  { %511 = vmatmul.mubr.msk.bf16.vlgmr.msra.gmra.mxu0 %vm713_vm3, %v596_v26 }
  0xa5   :  { %560 = shalt.err (!%p557_p4)
}
  0xa6   :  { %s598_s3 = smov 256   ;;  %s599_s19 = smov 16  }
  0xa7   :  { %386 = dma.vmem_to_hbm [thread:$0]  %s381_s17, 512, %s770_s5, [#allocation5], %s598_s3, %s598_s3, %s599_s19  }
  0xa8   :  { %s600_s22 = smov [#allocation2]  }
  0xa9   :  { %s368_s23 = sshll.u32 %s600_s22, 4  ;;  %s369_s23 = int_to_ptr.vmem [resolvable:$true] %s368_s23 }
  0xaa   :  { %s569_s5 = scalar_lea.vmem %s369_s23, 256  ;;  %p574_p6 = scmp.lt.s32.totalorder %s369_s23, %s369_s23 }
  0xab   :  { %p570_p5 = scmp.ne.s32.totalorder %s369_s23, %s569_s5  ;;  %p575_p7 = scmp.lt.s32.totalorder %s569_s5, %s569_s5 }
  0xad   :  { %p576_p8 = por %p575_p7, %p574_p6 }
  0xaf   :  { %p577_p9 = pnand %p576_p8, %p570_p5 }
 0x144   :  { %v153_v34 = vpop.f32.mrf.mxu0  ;;  %v242_v35 = vpop.f32.mrf.mxu1 }
 0x145   :  { %v243_v42 = vadd.f32 %v242_v35, %v153_v34 }
 0x146   :  { %v472_v36 = vpop.f32.mrf.mxu0  ;;  %v492_v37 = vpop.f32.mrf.mxu1 }
 0x148   :  { %v156_v38 = vpop.f32.mrf.mxu0  ;;  %v245_v39 = vpop.f32.mrf.mxu1 }
 0x149   :  { %v246_v46 = vadd.f32 %v245_v39, %v156_v38 }
 0x14a   :  { %v473_v40 = vpop.f32.mrf.mxu0  ;;  %v493_v41 = vpop.f32.mrf.mxu1 }
 0x164   :  { %v347_v43 = vpop.f32.mrf.mxu0 }
 0x165   :  { %v354_v44 = vadd.f32 %v347_v43, %v243_v42 }
 0x166   :  { %v512_v45 = vpop.f32.mrf.mxu0 }
 0x167   :  { %357 = vst.msk [vmem:[#allocation2] sm:$0xff] %vm356_vm4, %v354_v44 }
 0x168   :  { %v350_v47 = vpop.f32.mrf.mxu0 }
 0x169   :  { %v355_v48 = vadd.f32 %v350_v47, %v246_v46 }
 0x16a   :  { %v513_v49 = vpop.f32.mrf.mxu0 }
 0x16b   :  { %358 = vst.msk [vmem:[#allocation2 + $0x8] sm:$0xff] %vm356_vm4, %v355_v48 }
 0x16c   :  { %580 = shalt.err (!%p577_p9)
}
 0x16d   :  { %s601_s24 = smov 128   ;;  %s602_s25 = smov 8  }
 0x16e   :  { %374 = dma.vmem_to_hbm [thread:$0]  %s369_s23, 256, %s769_s4, [#allocation3], %s601_s24, %s601_s24, %s602_s25  }
 0x16f   :  { %589 = dma.done.wait [#allocation3], 256  }
 0x170   :  { %590 = vsyncadd [#allocation3], 4294967040 }
 0x171   :  { %591 = dma.done.wait [#allocation5], 512  }
 0x172   :  { %592 = vsyncadd [#allocation5], 4294966784 }
 0x173   :  { %393 = vsyncpa [#allocation3], 1 }
 0x174   :  { %394 = vsyncpa [#allocation5], 1 }

</bundles_post_ra>
